<compile_context>
chip_gen: v6e
topology: v6e:2x2x1
jax: 0.10.0
libtpu: 0.0.40
codegen_flags: <defaults>
</compile_context>

<pallas_src>
import jax
import jax.numpy as jnp
import numpy as np
from jax.experimental import pallas as pl
from jax.experimental.pallas import tpu as pltpu

BN_EPS = 1e-5
QID_BITS = 5                                  # qid_bitwidth
QMAX = float(2 ** (QID_BITS - 1) - 1)         # 15
QMIN = -float(2 ** (QID_BITS - 1))            # -16


def encoder_kernel(qs_ref, x_ref, w1_ref, t1_ref, w2_ref, t2_ref, o_ref):
    """One (BM, F) batch tile of the forward pass.

    qs_ref : SMEM (1,)      [quant scale]
    x_ref  : (BM, 64)  bf16 flattened input tile
    w1_ref : (64, 128) bf16 dense1 weight with BN1 scale folded in
    t1_ref : (1, 128)  f32  folded BN1 shift (includes dense1 bias)
    w2_ref : (128,128) bf16 dense2 weight with BN2 scale AND 1/quant_scale
                       folded in, zero-padded columns 16 -> 128
    t2_ref : (1, 128)  f32  folded BN2 shift (bias + BN, pre-divided by scale)
    o_ref  : (BM, 128) f32  quant-dequant output tile (cols >= 16 are zero)
    """
    # dense1 (+ folded BN1 scale) + shift + ReLU  (MXU bf16 -> f32 acc)
    h = jnp.dot(x_ref[...], w1_ref[...], preferred_element_type=jnp.float32)
    h = jnp.maximum(h + t1_ref[...], 0.0)

    # dense2 (+ folded BN2 scale, pre-divided by quant scale) + shift.
    # Result is already in quant units: y = (bn2(dense2(h))) / scale.
    y = jnp.dot(h.astype(w2_ref.dtype), w2_ref[...],
                preferred_element_type=jnp.float32)
    y = y + t2_ref[...]

    # QuantIdentity: 5-bit signed symmetric, precomputed per-tensor scale.
    q = jnp.clip(jnp.round(y), QMIN, QMAX)
    o_ref[...] = (q * qs_ref[0]).astype(o_ref.dtype)


def prepare_params(params):
    """One-time (load-time) parameter folding: BN fold, quant fold, pad, cast."""
    (w1, b1, g1, be1, m1, v1,
     w2, b2, g2, be2, m2, v2, q_thresh) = params

    # Fold inference-mode BatchNorm1d into per-feature affine.
    s1 = g1 / jnp.sqrt(v1 + BN_EPS)                      # (128,)
    t1 = be1 + (b1 - m1) * s1                            # (128,)
    s2 = g2 / jnp.sqrt(v2 + BN_EPS)                      # (16,)
    t2 = be2 + (b2 - m2) * s2                            # (16,)

    # Precomputed per-tensor symmetric quant scale.
    # TODO(synk): brevitas QuantIdentity uses a learned/EMA threshold at
    #             inference; we model it as a fixed per-tensor threshold param.
    scale = q_thresh / QMAX
    inv_scale = 1.0 / scale

    # Fold BN scales (and, for the second layer, the quant inverse scale)
    # into the transposed weights; cast MXU operands to bf16.
    w1_eff = (w1.T * s1[None, :]).astype(jnp.bfloat16)   # (64, 128)
    w2_eff = w2.T * (s2 * inv_scale)[None, :]            # (128, 16) f32
    t2_eff = t2 * inv_scale                              # (16,)     f32

    # Lane-dense output: pad dense2 output columns 16 -> 128 with zeros.
    n_out = w2_eff.shape[1]
    n_pad = max(128, ((n_out + 127) // 128) * 128)
    w2_pad = jnp.zeros((w2_eff.shape[0], n_pad), jnp.float32)
    w2_pad = w2_pad.at[:, :n_out].set(w2_eff).astype(jnp.bfloat16)
    t2_pad = jnp.zeros((n_pad,), jnp.float32).at[:n_out].set(t2_eff)

    qs = jnp.asarray([scale], dtype=jnp.float32)

    return {
        "w1": w1_eff,
        "t1": t1.reshape(1, -1).astype(jnp.float32),
        "w2": w2_pad,
        "t2": t2_pad.reshape(1, -1),
        "qs": qs,
        "n_out": n_out,
    }


def encoder_forward(x_nchw, prepared, *, block_rows=1024):
    """Flatten (NCHW -> (B, F)) and run the batch-tiled Pallas kernel."""
    B = x_nchw.shape[0]
    x_flat = x_nchw.reshape(B, -1).astype(jnp.bfloat16)  # nn.Flatten semantics
    F = x_flat.shape[1]

    w1, t1 = prepared["w1"], prepared["t1"]
    w2, t2 = prepared["w2"], prepared["t2"]
    qs, n_out = prepared["qs"], prepared["n_out"]
    H = w1.shape[1]
    NP = w2.shape[1]

    # Batch tile: multiple of 8 sublanes, capped at block_rows; pad B up to it.
    bm = min(block_rows, ((B + 7) // 8) * 8)
    Bp = ((B + bm - 1) // bm) * bm
    if Bp != B:
        x_in = jnp.zeros((Bp, F), jnp.bfloat16).at[:B].set(x_flat)
    else:
        x_in = x_flat

    grid = (Bp // bm,)
    out = pl.pallas_call(
        encoder_kernel,
        out_shape=jax.ShapeDtypeStruct((Bp, NP), jnp.float32),
        grid=grid,
        in_specs=[
            pl.BlockSpec(memory_space=pltpu.MemorySpace.SMEM),   # quant scale
            pl.BlockSpec((bm, F), lambda i: (i, 0)),             # x tile
            pl.BlockSpec((F, H), lambda i: (0, 0)),              # w1 (resident)
            pl.BlockSpec((1, H), lambda i: (0, 0)),              # t1 (resident)
            pl.BlockSpec((H, NP), lambda i: (0, 0)),             # w2 (resident)
            pl.BlockSpec((1, NP), lambda i: (0, 0)),             # t2 (resident)
        ],
        out_specs=pl.BlockSpec((bm, NP), lambda i: (i, 0)),
        compiler_params=pltpu.CompilerParams(
            dimension_semantics=("parallel",)),
    )(qs, x_in, w1, t1, w2, t2)

    return out[:B, :n_out]


def reference_forward(x_nchw, params):
    """Pure-JAX f32 reference (inference-mode BN, fixed quant scale)."""
    (w1, b1, g1, be1, m1, v1,
     w2, b2, g2, be2, m2, v2, q_thresh) = params
    B = x_nchw.shape[0]
    x = x_nchw.reshape(B, -1)
    h = x @ w1.T + b1
    h = (h - m1) / jnp.sqrt(v1 + BN_EPS) * g1 + be1
    h = jnp.maximum(h, 0.0)
    y = h @ w2.T + b2
    y = (y - m2) / jnp.sqrt(v2 + BN_EPS) * g2 + be2
    scale = q_thresh / QMAX
    q = jnp.clip(jnp.round(y / scale), QMIN, QMAX)
    return q * scale


def init_params(key, input_length=64, num_dense_feat=128, output_length=16):
    ks = jax.random.split(key, 12)
    # Linear layers: PyTorch shapes weight (out, in), bias (out,)
    lim1 = 1.0 / jnp.sqrt(input_length)
    w1 = jax.random.uniform(ks[0], (num_dense_feat, input_length),
                            minval=-lim1, maxval=lim1, dtype=jnp.float32)
    b1 = jax.random.uniform(ks[1], (num_dense_feat,),
                            minval=-lim1, maxval=lim1, dtype=jnp.float32)
    lim2 = 1.0 / jnp.sqrt(num_dense_feat)
    w2 = jax.random.uniform(ks[2], (output_length, num_dense_feat),
                            minval=-lim2, maxval=lim2, dtype=jnp.float32)
    b2 = jax.random.uniform(ks[3], (output_length,),
                            minval=-lim2, maxval=lim2, dtype=jnp.float32)
    # BatchNorm1d params (non-trivial deterministic stats; eval-mode BN)
    g1 = 1.0 + 0.1 * jax.random.normal(ks[4], (num_dense_feat,), jnp.float32)
    be1 = 0.1 * jax.random.normal(ks[5], (num_dense_feat,), jnp.float32)
    m1 = 0.05 * jax.random.normal(ks[6], (num_dense_feat,), jnp.float32)
    v1 = 1.0 + 0.1 * jax.random.uniform(ks[7], (num_dense_feat,), jnp.float32)
    g2 = 1.0 + 0.1 * jax.random.normal(ks[8], (output_length,), jnp.float32)
    be2 = 0.1 * jax.random.normal(ks[9], (output_length,), jnp.float32)
    m2 = 0.05 * jax.random.normal(ks[10], (output_length,), jnp.float32)
    v2 = 1.0 + 0.1 * jax.random.uniform(ks[11], (output_length,), jnp.float32)
    # Fixed per-tensor activation threshold for the 5-bit quant identity.
    q_thresh = jnp.float32(4.0)
    return (w1, b1, g1, be1, m1, v1, w2, b2, g2, be2, m2, v2, q_thresh)


if __name__ == "__main__":
    key = jax.random.PRNGKey(0)
    k_x, k_p = jax.random.split(key)

    # Small NCHW input whose flattened length is input_length=64: (B, C, H, W)
    B, C, H, W = 8, 4, 4, 4
    x = jax.random.normal(k_x, (B, C, H, W), dtype=jnp.float32)

    params = init_params(k_p)
    prepared = prepare_params(params)          # one-time folding, off hot path

    out = encoder_forward(x, prepared)
    jax.block_until_ready(out)

    assert out.shape == (B, 16) and out.dtype == jnp.float32
    assert bool(jnp.all(jnp.isfinite(out)))

    # Sanity check vs f32 reference: bf16 matmul rounding may flip a value by
    # at most one quant step (scale = 4/15 ~= 0.267), so allow one step.
    ref = reference_forward(x, params)
    np.testing.assert_allclose(np.asarray(out), np.asarray(ref), atol=0.28)

    print("KERNEL_OK")
</pallas_src>

<mosaic_0001>
module attributes {stable_mosaic.version = 11 : i64} {
  func.func @encoder_kernel(%arg0: i32, %arg1: memref<1xf32, #tpu.memory_space<smem>>, %arg2: memref<8x64xbf16, #tpu.memory_space<vmem>>, %arg3: memref<64x128xbf16, #tpu.memory_space<vmem>>, %arg4: memref<1x128xf32, #tpu.memory_space<vmem>>, %arg5: memref<128x128xbf16, #tpu.memory_space<vmem>>, %arg6: memref<1x128xf32, #tpu.memory_space<vmem>>, %arg7: memref<8x128xf32, #tpu.memory_space<vmem>>) attributes {dimension_semantics = [#tpu.dimension_semantics<parallel>], iteration_bounds = array<i64: 1>, scalar_prefetch = 0 : i64, scratch_operands = 0 : i64, tpu.core_type = #tpu.core_type<tc>, window_params = [{transform_indices = @transform_0, window_bounds = array<i64: 1>}, {transform_indices = @transform_1, window_bounds = array<i64: 8, 64>}, {pipeline_mode = #tpu.pipeline_mode<synchronous>, transform_indices = @transform_2, window_bounds = array<i64: 64, 128>}, {pipeline_mode = #tpu.pipeline_mode<synchronous>, transform_indices = @transform_3, window_bounds = array<i64: 1, 128>}, {pipeline_mode = #tpu.pipeline_mode<synchronous>, transform_indices = @transform_4, window_bounds = array<i64: 128, 128>}, {pipeline_mode = #tpu.pipeline_mode<synchronous>, transform_indices = @transform_5, window_bounds = array<i64: 1, 128>}, {transform_indices = @transform_6, window_bounds = array<i64: 8, 128>}]} {
    %c0 = arith.constant 0 : index
    %c0_0 = arith.constant 0 : index
    %0 = vector.load %arg2[%c0, %c0_0] : memref<8x64xbf16, #tpu.memory_space<vmem>>, vector<8x64xbf16>
    %c0_1 = arith.constant 0 : index
    %c0_2 = arith.constant 0 : index
    %1 = vector.load %arg3[%c0_1, %c0_2] : memref<64x128xbf16, #tpu.memory_space<vmem>>, vector<64x128xbf16>
    %cst = arith.constant dense<0.000000e+00> : vector<8x128xf32>
    %2 = tpu.matmul %0, %1, %cst {dimension_numbers = #tpu.dot_dimension_numbers<[1], [0], [0], [1], [0, 0, 1, 1], [], []>} : vector<8x64xbf16>, vector<64x128xbf16>, vector<8x128xf32> -> vector<8x128xf32>
    %c0_3 = arith.constant 0 : index
    %c0_4 = arith.constant 0 : index
    %3 = vector.load %arg4[%c0_3, %c0_4] : memref<1x128xf32, #tpu.memory_space<vmem>>, vector<1x128xf32>
    %4 = vector.broadcast %3 : vector<1x128xf32> to vector<8x128xf32>
    %5 = arith.addf %2, %4 : vector<8x128xf32>
    %cst_5 = arith.constant 0.000000e+00 : f32
    %6 = vector.broadcast %cst_5 : f32 to vector<8x128xf32>
    %7 = arith.maximumf %5, %6 : vector<8x128xf32>
    %8 = arith.truncf %7 : vector<8x128xf32> to vector<8x128xbf16>
    %c0_6 = arith.constant 0 : index
    %c0_7 = arith.constant 0 : index
    %9 = vector.load %arg5[%c0_6, %c0_7] : memref<128x128xbf16, #tpu.memory_space<vmem>>, vector<128x128xbf16>
    %cst_8 = arith.constant dense<0.000000e+00> : vector<8x128xf32>
    %10 = tpu.matmul %8, %9, %cst_8 {dimension_numbers = #tpu.dot_dimension_numbers<[1], [0], [0], [1], [0, 0, 1, 1], [], []>} : vector<8x128xbf16>, vector<128x128xbf16>, vector<8x128xf32> -> vector<8x128xf32>
    %c0_9 = arith.constant 0 : index
    %c0_10 = arith.constant 0 : index
    %11 = vector.load %arg6[%c0_9, %c0_10] : memref<1x128xf32, #tpu.memory_space<vmem>>, vector<1x128xf32>
    %12 = vector.broadcast %11 : vector<1x128xf32> to vector<8x128xf32>
    %13 = arith.addf %10, %12 : vector<8x128xf32>
    %14 = math.roundeven %13 : vector<8x128xf32>
    %cst_11 = arith.constant -1.600000e+01 : f32
    %cst_12 = arith.constant 1.500000e+01 : f32
    %15 = vector.broadcast %cst_11 : f32 to vector<8x128xf32>
    %16 = arith.maximumf %15, %14 : vector<8x128xf32>
    %17 = vector.broadcast %cst_12 : f32 to vector<8x128xf32>
    %18 = arith.minimumf %17, %16 : vector<8x128xf32>
    %c0_13 = arith.constant 0 : index
    %19 = memref.load %arg1[%c0_13] : memref<1xf32, #tpu.memory_space<smem>>
    %20 = vector.broadcast %19 : f32 to vector<8x128xf32>
    %21 = arith.mulf %18, %20 : vector<8x128xf32>
    %c0_14 = arith.constant 0 : index
    %c0_15 = arith.constant 0 : index
    %22 = vector.load %arg7[%c0_14, %c0_15] : memref<8x128xf32, #tpu.memory_space<vmem>>, vector<8x128xf32>
    tpu.vector_store %arg7[%c0_14, %c0_15], %21 {strides = array<i32>} : memref<8x128xf32, #tpu.memory_space<vmem>>, vector<8x128xf32>,
    return
  }
  func.func @transform_0(%arg0: i32) -> i32 {
    %c0_i32 = arith.constant 0 : i32
    %c0_i32_0 = arith.constant 0 : i32
    return %c0_i32 : i32
  }
  func.func @transform_1(%arg0: i32) -> (i32, i32) {
    %c0_i32 = arith.constant 0 : i32
    %c0_i32_0 = arith.constant 0 : i32
    return %arg0, %c0_i32 : i32, i32
  }
  func.func @transform_2(%arg0: i32) -> (i32, i32) {
    %c0_i32 = arith.constant 0 : i32
    %c0_i32_0 = arith.constant 0 : i32
    %c0_i32_1 = arith.constant 0 : i32
    return %c0_i32, %c0_i32_0 : i32, i32
  }
  func.func @transform_3(%arg0: i32) -> (i32, i32) {
    %c0_i32 = arith.constant 0 : i32
    %c0_i32_0 = arith.constant 0 : i32
    %c0_i32_1 = arith.constant 0 : i32
    return %c0_i32, %c0_i32_0 : i32, i32
  }
  func.func @transform_4(%arg0: i32) -> (i32, i32) {
    %c0_i32 = arith.constant 0 : i32
    %c0_i32_0 = arith.constant 0 : i32
    %c0_i32_1 = arith.constant 0 : i32
    return %c0_i32, %c0_i32_0 : i32, i32
  }
  func.func @transform_5(%arg0: i32) -> (i32, i32) {
    %c0_i32 = arith.constant 0 : i32
    %c0_i32_0 = arith.constant 0 : i32
    %c0_i32_1 = arith.constant 0 : i32
    return %c0_i32, %c0_i32_0 : i32, i32
  }
  func.func @transform_6(%arg0: i32) -> (i32, i32) {
    %c0_i32 = arith.constant 0 : i32
    %c0_i32_0 = arith.constant 0 : i32
    return %arg0, %c0_i32 : i32, i32
  }
}

</mosaic_0001>

<bundles_post_ra>
// kernel: tpu_custom_call.1
= control target key start
LH: loop header
LB: loop body
LE: loop exit
PB: predicated region body
PF: predicated region fallthrough
CT: control target
= control target key end

     0   :  { %12 = vsyncpa [#allocation4], 0  ;;  %s524_s0 = inlined_call_operand.<no memory space> [shape: f32[1], index: 0, kind: input, shape index: {}]   ;;  %s525_s1 = inlined_call_operand.hbm [shape: bf16[8,64], index: 1, kind: input, shape index: {}]   ;;  %s526_s2 = inlined_call_operand.hbm [shape: bf16[64,128], index: 2, kind: input, shape index: {}]   ;;  %s527_s3 = inlined_call_operand.vmem [shape: f32[1,128], index: 3, kind: input, shape index: {}]   ;;  %s528_s4 = inlined_call_operand.hbm [shape: bf16[128,128], index: 4, kind: input, shape index: {}]   ;;  %s529_s5 = inlined_call_operand.vmem [shape: f32[1,128], index: 5, kind: input, shape index: {}]   ;;  %s530_s6 = inlined_call_operand.hbm [shape: f32[8,128], index: 6, kind: output, shape index: {}]  }
   0x1   :  { %13 = vsyncpa [#allocation7], 0 }
   0x2   :  { %14 = vsyncpa [#allocation5], 0  ;;  %s460_s21 = smov [#allocation6]  }
   0x3   :  { %s32_s22 = sshll.u32 %s460_s21, 4  ;;  %s33_s22 = int_to_ptr.vmem [resolvable:$true] %s32_s22 }
   0x4   :  { %s382_s23 = scalar_lea.vmem %s33_s22, 512  ;;  %p387_p1 = scmp.lt.s32.totalorder %s33_s22, %s33_s22 }
   0x5   :  { %p383_p0 = scmp.ne.s32.totalorder %s33_s22, %s382_s23  ;;  %p388_p2 = scmp.lt.s32.totalorder %s382_s23, %s382_s23 }
   0x7   :  { %p389_p3 = por %p388_p2, %p387_p1 }
   0x9   :  { %p390_p4 = pnand %p389_p3, %p383_p0 }
   0xb   :  { %393 = shalt.err (!%p390_p4)
}
   0xc   :  { %s461_s24 = smov 64   ;;  %s462_s25 = smov 4  }
   0xd   :  { %38 = dma.hbm_to_vmem [thread:$0]  %s526_s2, 512, %s33_s22, [#allocation7], %s461_s24, %s461_s24, %s462_s25  }
   0xe   :  { %s463_s28 = smov [#allocation3]   ;;  %s464_s30 = smov [#allocation8]  }
   0xf   :  { %s23_s29 = sshll.u32 %s463_s28, 4  ;;  %s46_s7 = sshll.u32 %s464_s30, 4  ;;  %s24_s29 = int_to_ptr.vmem [resolvable:$true] %s23_s29  ;;  %s47_s7 = int_to_ptr.vmem [resolvable:$true] %s46_s7 }
  0x10   :  { %s402_s8 = scalar_lea.vmem %s24_s29, 64  ;;  %p407_p6 = scmp.lt.s32.totalorder %s24_s29, %s24_s29 }
  0x11   :  { %p403_p5 = scmp.ne.s32.totalorder %s24_s29, %s402_s8  ;;  %p408_p7 = scmp.lt.s32.totalorder %s402_s8, %s402_s8 }
  0x13   :  { %p409_p8 = por %p408_p7, %p407_p6 }
  0x15   :  { %p410_p9 = pnand %p409_p8, %p403_p5 }
  0x17   :  { %413 = shalt.err (!%p410_p9)
}
  0x18   :  { %26 = dma.hbm_to_vmem [thread:$0]  %s525_s1, 64, %s24_s29, [#allocation4]  }
  0x19   :  { %s422_s11 = scalar_lea.vmem %s47_s7, 1024  ;;  %p427_p11 = scmp.lt.s32.totalorder %s47_s7, %s47_s7 }
  0x1a   :  { %p423_p10 = scmp.ne.s32.totalorder %s47_s7, %s422_s11  ;;  %p428_p12 = scmp.lt.s32.totalorder %s422_s11, %s422_s11 }
  0x1c   :  { %p429_p13 = por %p428_p12, %p427_p11 }
  0x1e   :  { %p430_p0 = pnand %p429_p13, %p423_p10 }
  0x20   :  { %433 = shalt.err (!%p430_p0)
}
  0x21   :  { %52 = dma.hbm_to_vmem [thread:$0]  %s528_s4, 1024, %s47_s7, [#allocation7], %s461_s24, %s461_s24, %s462_s25  }
  0x22   :  { %454 = dma.done.wait [#allocation4], 64  }
  0x23   :  { %455 = vsyncadd [#allocation4], 4294967232 }
  0x24   :  { %456 = dma.done.wait [#allocation7], 1536  }
  0x25   :  { %457 = vsyncadd [#allocation7], 4294965760  ;;  %v465_v0 = vmov 0.0   ;;  %vm466_vm0 = vmmov 0   ;;  %v362_v1 = vld [vmem:[#allocation6 + $0x18] sm:$0xff]   ;;  %v363_v2 = vld [vmem:[#allocation6 + $0x10] sm:$0xff]   ;;  %v266_v36 = vstv %s524_s0 }
  0x26   :  { %314 = vmatprep.subr.bf16.mxu0 %v465_v0  ;;  %322 = vmatprep.mubr.msk.bf16.mxu0 %vm466_vm0, %v465_v0  ;;  %v366_v3 = vld [vmem:[#allocation8 + $0x38] sm:$0xff]   ;;  %v364_v4 = vld [vmem:[#allocation6 + $0x8] sm:$0xff]   ;;  %v367_v5 = vld [vmem:[#allocation8 + $0x30] sm:$0xff]   ;;  %vm105_vm1 = vcmask 523264   ;;  %s467_s16 = smov [#allocation9]  }
  0x27   :  { %326 = vmatprep.subr.bf16.mxu1 %v465_v0  ;;  %342 = vmatprep.mubr.msk.bf16.mxu1 %vm466_vm0, %v465_v0  ;;  %v365_v6 = vld [vmem:[#allocation6] sm:$0xff]   ;;  %v368_v7 = vld [vmem:[#allocation8 + $0x28] sm:$0xff]   ;;  %v65_v8 = vld [vmem:[#allocation3] sm:$0xf] }
  0x28   :  { %315 = vmatpush3.bf16.msra.mxu0 %v362_v1  ;;  %327 = vmatpush3.bf16.msra.mxu1 %v366_v3  ;;  %v369_v9 = vld [vmem:[#allocation8 + $0x20] sm:$0xff]   ;;  %v370_v10 = vld [vmem:[#allocation8 + $0x18] sm:$0xff]   ;;  %v371_v11 = vld [vmem:[#allocation8 + $0x10] sm:$0xff]  }
  0x29   :  { %316 = vmatprep.subr.bf16.mxu0 %v465_v0  ;;  %328 = vmatprep.subr.bf16.mxu1 %v465_v0  ;;  %v372_v12 = vld [vmem:[#allocation8 + $0x8] sm:$0xff]   ;;  %v373_v13 = vld [vmem:[#allocation8] sm:$0xff]   ;;  %v285_v14 = vld [vmem:[%s527_s3] ss:$0 sm:$0xff] }
  0x2a   :  { %v291_v22 = vld [vmem:[%s529_s5] ss:$0 sm:$0xff]  ;;  %s275_s5 = sshll.u32 %s467_s16, 4  ;;  %s276_s5 = int_to_ptr.vmem [resolvable:$true] %s275_s5 }
  0x2b   :  { %s434_s17 = scalar_lea.vmem %s276_s5, 128  ;;  %p439_p2 = scmp.lt.s32.totalorder %s276_s5, %s276_s5 }
  0x2c   :  { %317 = vmatpush3.bf16.msra.mxu0 %v363_v2  ;;  %329 = vmatpush3.bf16.msra.mxu1 %v367_v5  ;;  %p435_p1 = scmp.ne.s32.totalorder %s276_s5, %s434_s17  ;;  %p440_p3 = scmp.lt.s32.totalorder %s434_s17, %s434_s17 }
  0x2d   :  { %318 = vmatprep.subr.bf16.mxu0 %v465_v0  ;;  %330 = vmatprep.subr.bf16.mxu1 %v465_v0 }
  0x2e   :  { %p441_p4 = por %p440_p3, %p439_p2 }
  0x30   :  { %319 = vmatpush3.bf16.msra.mxu0 %v364_v4  ;;  %331 = vmatpush3.bf16.msra.mxu1 %v368_v7  ;;  %p442_p5 = pnand %p441_p4, %p435_p1 }
  0x31   :  { %320 = vmatprep.subr.bf16.mxu0 %v465_v0  ;;  %332 = vmatprep.subr.bf16.mxu1 %v465_v0 }
  0x34   :  { %321 = vmatpush3.bf16.msra.mxu0 %v365_v6  ;;  %333 = vmatpush3.bf16.msra.mxu1 %v369_v9 }
  0x35   :  { %334 = vmatprep.subr.bf16.mxu1 %v465_v0 }
  0x37   :  { %323 = vmatmul.mubr.msk.bf16.vlgmr.msra.gmra.mxu0 %vm105_vm1, %v65_v8 }
  0x38   :  { %335 = vmatpush3.bf16.msra.mxu1 %v370_v10 }
  0x39   :  { %336 = vmatprep.subr.bf16.mxu1 %v465_v0 }
  0x3c   :  { %337 = vmatpush3.bf16.msra.mxu1 %v371_v11 }
  0x3d   :  { %338 = vmatprep.subr.bf16.mxu1 %v465_v0 }
  0x40   :  { %339 = vmatpush3.bf16.msra.mxu1 %v372_v12 }
  0x41   :  { %340 = vmatprep.subr.bf16.mxu1 %v465_v0 }
  0x44   :  { %341 = vmatpush3.bf16.msra.mxu1 %v373_v13 }
  0xf7   :  { %v143_v15 = vpop.f32.mrf.mxu0 }
  0xf8   :  { %v144_v16 = vadd.f32 %v285_v14, %v143_v15 }
  0xf9   :  { %v324_v17 = vpop.f32.mrf.mxu0 }
  0xfa   :  { %v149_v18 = vmax.f32 %v144_v16, 0.0 }
  0xfb   :  { %v146_v19 = vpop.f32.mrf.mxu0 }
  0xfc   :  { %v150_v20 = vpack.c.bf16 %v149_v18, %v149_v18 }
  0xfd   :  { %v325_v21 = vpop.f32.mrf.mxu0 }
  0xfe   :  { %343 = vmatmul.mubr.bf16.vlgmr.msra.gmra.mxu1 %v150_v20 }
 0x1be   :  { %v256_v23 = vpop.f32.mrf.mxu1 }
 0x1bf   :  { %v257_v24 = vadd.f32 %v291_v22, %v256_v23 }
 0x1c0   :  { %v344_v25 = vpop.f32.mrf.mxu1 }
 0x1c1   :  { %v348_v26 = vcvt.f32.s32 %v257_v24  ;;  %v346_v29 = vand.u32 2147483647, %v257_v24  ;;  %v351_v32 = vand.u32 2147483648, %v257_v24 }
 0x1c2   :  { %v259_v27 = vpop.f32.mrf.mxu1 }
 0x1c3   :  { %v349_v28 = vcvt.s32.f32 %v348_v26  ;;  %vm347_vm2 = vcmp.lt.f32.partialorder %v346_v29, 8388608.0 }
 0x1c4   :  { %v345_v30 = vpop.f32.mrf.mxu1 }
 0x1c5   :  { %v350_v31 = vand.u32 2147483647, %v349_v28 }
 0x1c7   :  { %v352_v33 = vor.u32 %v351_v32, %v350_v31 }
 0x1c9   :  { %v353_v34 = vsel %vm347_vm2, %v352_v33, %v257_v24 }
 0x1ca   :  { %v263_v35 = vmax.f32 %v353_v34, -16.0 }
 0x1cc   :  { %v264_v37 = vmin.f32 %v263_v35, 15.0 }
 0x1ce   :  { %v267_v38 = vmul.f32 %v266_v36, %v264_v37 }
 0x1d0   :  { %268 = vst [vmem:[#allocation9] sm:$0xff] %v267_v38 }
 0x1d1   :  { %445 = shalt.err (!%p442_p5)
}
 0x1d2   :  { %278 = dma.vmem_to_hbm [thread:$0]  %s276_s5, 128, %s530_s6, [#allocation5]  }
 0x1d3   :  { %458 = dma.done.wait [#allocation5], 128  }
 0x1d4   :  { %459 = vsyncadd [#allocation5], 4294967168 }
 0x1d5   :  { %282 = vsyncpa [#allocation4], 1 }
 0x1d6   :  { %283 = vsyncpa [#allocation7], 1 }
 0x1d7   :  { %284 = vsyncpa [#allocation5], 1 }

</bundles_post_ra>
